<compile_context>
chip_gen: v6e
topology: v6e:2x2x1
jax: 0.10.0
libtpu: 0.0.40
codegen_flags: <defaults>
</compile_context>

<pallas_src>
import jax
import jax.numpy as jnp
from jax.experimental import pallas as pl
from jax.experimental.pallas import tpu as pltpu


LAYERS = [4, 32, 32, 1]   # (x, y, z, t) -> p
MAX_TILE = 8192           # max batch-lane columns per grid step (multiple of 128)


def _round_up(a, m):
    return ((a + m - 1) // m) * m


def _mlp_kernel(x_ref, w1_ref, b1_ref, w2_ref, b2_ref, w3_ref, b3_ref, o_ref):
    # Feature-major: x is (4, TN), activations are (32, TN), output is (1, TN).
    x = x_ref[...]                                                    # (4, TN)
    h = jnp.tanh(
        jnp.dot(w1_ref[...], x, preferred_element_type=jnp.float32)  # (32, TN)
        + b1_ref[...]
    )
    h = jnp.tanh(
        jnp.dot(w2_ref[...], h, preferred_element_type=jnp.float32)  # (32, TN)
        + b2_ref[...]
    )
    o = (
        jnp.dot(w3_ref[...], h, preferred_element_type=jnp.float32)  # (1, TN)
        + b3_ref[...]
    )
    o_ref[...] = o.astype(o_ref.dtype)


def fluidnet_forward(x, params, *, max_tile=MAX_TILE):
    """x: (N, 4) float32; params: list of (W (out,in), b (out,1)) per layer.

    Returns (N, 1) float32, matching the PyTorch FluidNet forward pass.
    """
    (w1, b1), (w2, b2), (w3, b3) = params
    n, d_in = x.shape
    d_out = w3.shape[0]

    # Lane tile: multiple of 128, capped at max_tile, and chosen so the grid
    # has >= 2 steps whenever possible (v7x has 2 TensorCores).
    tile = min(max_tile, _round_up(max(pl.cdiv(n, 2), 1), 128))
    n_pad = _round_up(n, tile)
    grid = n_pad // tile

    # Feature-major input, padded along the lane (batch) axis.  The transpose +
    # pad fuse into a single extra HBM pass; the kernel itself is EUP/overhead
    # bound, so this does not move the roofline.
    x_t = jnp.pad(x.T, ((0, 0), (0, n_pad - n)))                       # (4, n_pad)

    def _const_spec(shape):
        # Full weight / bias block, same block every grid step (VMEM resident).
        return pl.BlockSpec(shape, lambda i: (0, 0))

    grid_spec = pltpu.PrefetchScalarGridSpec(
        num_scalar_prefetch=0,
        grid=(grid,),
        in_specs=[
            pl.BlockSpec((d_in, tile), lambda i: (0, i)),
            _const_spec(w1.shape), _const_spec(b1.shape),
            _const_spec(w2.shape), _const_spec(b2.shape),
            _const_spec(w3.shape), _const_spec(b3.shape),
        ],
        out_specs=pl.BlockSpec((d_out, tile), lambda i: (0, i)),
    )

    h1, h2 = w1.shape[0], w2.shape[0]
    flops = 2 * n_pad * (d_in * h1 + h1 * h2 + h2 * d_out)
    transcendentals = (h1 + h2) * n_pad
    bytes_accessed = 4 * (
        n_pad * (d_in + d_out)
        + d_in * h1 + h1 + h1 * h2 + h2 + h2 * d_out + d_out
    )

    out_t = pl.pallas_call(
        _mlp_kernel,
        out_shape=jax.ShapeDtypeStruct((d_out, n_pad), jnp.float32),
        grid_spec=grid_spec,
        compiler_params=pltpu.CompilerParams(
            dimension_semantics=("parallel",),
        ),
        cost_estimate=pl.CostEstimate(
            flops=flops,
            transcendentals=transcendentals,
            bytes_accessed=bytes_accessed,
        ),
    )(x_t, w1, b1, w2, b2, w3, b3)

    # Back to (N, 1), dropping the padded tail.  For d_out == 1 this transpose
    # is layout-trivial (bitcast-equivalent); the slice is tiny.
    return out_t.T[:n, :]


def init_params(key, layers):
    """Deterministic init mimicking PyTorch nn.Linear default (uniform +/- 1/sqrt(fan_in)).
    Weights stored PyTorch-style as (out, in); biases as (out, 1) columns."""
    params = []
    for i in range(len(layers) - 1):
        fan_in, fan_out = layers[i], layers[i + 1]
        key, kw, kb = jax.random.split(key, 3)
        bound = 1.0 / (fan_in ** 0.5)
        w = jax.random.uniform(kw, (fan_out, fan_in), jnp.float32, -bound, bound)
        b = jax.random.uniform(kb, (fan_out, 1), jnp.float32, -bound, bound)
        params.append((w, b))
    return params


def fluidnet_reference(x, params):
    h = x
    for i, (w, b) in enumerate(params):
        h = h @ w.T + b.T
        if i < len(params) - 1:
            h = jnp.tanh(h)
    return h


if __name__ == "__main__":
    key = jax.random.PRNGKey(0)
    key, kx = jax.random.split(key)

    # Small batch of (x, y, z, t) points; deliberately NOT a multiple of 128
    # to exercise the pad-and-slice tail handling.
    n = 300
    x = jax.random.normal(kx, (n, LAYERS[0]), jnp.float32)
    params = init_params(key, LAYERS)

    fwd = jax.jit(lambda xx: fluidnet_forward(xx, params))
    out = jax.block_until_ready(fwd(x))
    ref = fluidnet_reference(x, params)

    assert out.shape == (n, LAYERS[-1])
    assert jnp.allclose(out, ref, atol=1e-5, rtol=1e-5)

    print("KERNEL_OK")
</pallas_src>

<mosaic_0001>
module attributes {stable_mosaic.version = 11 : i64} {
  func.func @_mlp_kernel(%arg0: i32, %arg1: memref<4x256xf32, #tpu.memory_space<vmem>>, %arg2: memref<32x4xf32, #tpu.memory_space<vmem>>, %arg3: memref<32x1xf32, #tpu.memory_space<vmem>>, %arg4: memref<32x32xf32, #tpu.memory_space<vmem>>, %arg5: memref<32x1xf32, #tpu.memory_space<vmem>>, %arg6: memref<1x32xf32, #tpu.memory_space<vmem>>, %arg7: memref<1x1xf32, #tpu.memory_space<vmem>>, %arg8: memref<1x256xf32, #tpu.memory_space<vmem>>) attributes {dimension_semantics = [#tpu.dimension_semantics<parallel>], iteration_bounds = array<i64: 2>, scalar_prefetch = 0 : i64, scratch_operands = 0 : i64, tpu.core_type = #tpu.core_type<tc>, window_params = [{transform_indices = @transform_0, window_bounds = array<i64: 4, 256>}, {pipeline_mode = #tpu.pipeline_mode<synchronous>, transform_indices = @transform_1, window_bounds = array<i64: 32, 4>}, {pipeline_mode = #tpu.pipeline_mode<synchronous>, transform_indices = @transform_2, window_bounds = array<i64: 32, 1>}, {pipeline_mode = #tpu.pipeline_mode<synchronous>, transform_indices = @transform_3, window_bounds = array<i64: 32, 32>}, {pipeline_mode = #tpu.pipeline_mode<synchronous>, transform_indices = @transform_4, window_bounds = array<i64: 32, 1>}, {pipeline_mode = #tpu.pipeline_mode<synchronous>, transform_indices = @transform_5, window_bounds = array<i64: 1, 32>}, {pipeline_mode = #tpu.pipeline_mode<synchronous>, transform_indices = @transform_6, window_bounds = array<i64: 1, 1>}, {transform_indices = @transform_7, window_bounds = array<i64: 1, 256>}]} {
    %c0 = arith.constant 0 : index
    %c0_0 = arith.constant 0 : index
    %0 = vector.load %arg1[%c0, %c0_0] : memref<4x256xf32, #tpu.memory_space<vmem>>, vector<4x256xf32>
    %c0_1 = arith.constant 0 : index
    %c0_2 = arith.constant 0 : index
    %1 = vector.load %arg2[%c0_1, %c0_2] : memref<32x4xf32, #tpu.memory_space<vmem>>, vector<32x4xf32>
    %cst = arith.constant dense<0.000000e+00> : vector<32x256xf32>
    %2 = tpu.matmul %1, %0, %cst {dimension_numbers = #tpu.dot_dimension_numbers<[1], [0], [0], [1], [0, 0, 1, 1], [], []>} : vector<32x4xf32>, vector<4x256xf32>, vector<32x256xf32> -> vector<32x256xf32>
    %c0_3 = arith.constant 0 : index
    %c0_4 = arith.constant 0 : index
    %3 = vector.load %arg3[%c0_3, %c0_4] : memref<32x1xf32, #tpu.memory_space<vmem>>, vector<32x1xf32>
    %4 = vector.broadcast %3 : vector<32x1xf32> to vector<32x256xf32>
    %5 = arith.addf %2, %4 : vector<32x256xf32>
    %6 = math.tanh %5 : vector<32x256xf32>
    %c0_5 = arith.constant 0 : index
    %c0_6 = arith.constant 0 : index
    %7 = vector.load %arg4[%c0_5, %c0_6] : memref<32x32xf32, #tpu.memory_space<vmem>>, vector<32x32xf32>
    %cst_7 = arith.constant dense<0.000000e+00> : vector<32x256xf32>
    %8 = tpu.matmul %7, %6, %cst_7 {dimension_numbers = #tpu.dot_dimension_numbers<[1], [0], [0], [1], [0, 0, 1, 1], [], []>} : vector<32x32xf32>, vector<32x256xf32>, vector<32x256xf32> -> vector<32x256xf32>
    %c0_8 = arith.constant 0 : index
    %c0_9 = arith.constant 0 : index
    %9 = vector.load %arg5[%c0_8, %c0_9] : memref<32x1xf32, #tpu.memory_space<vmem>>, vector<32x1xf32>
    %10 = vector.broadcast %9 : vector<32x1xf32> to vector<32x256xf32>
    %11 = arith.addf %8, %10 : vector<32x256xf32>
    %12 = math.tanh %11 : vector<32x256xf32>
    %c0_10 = arith.constant 0 : index
    %c0_11 = arith.constant 0 : index
    %13 = vector.load %arg6[%c0_10, %c0_11] : memref<1x32xf32, #tpu.memory_space<vmem>>, vector<1x32xf32>
    %cst_12 = arith.constant dense<0.000000e+00> : vector<1x256xf32>
    %14 = tpu.matmul %13, %12, %cst_12 {dimension_numbers = #tpu.dot_dimension_numbers<[1], [0], [0], [1], [0, 0, 1, 1], [], []>} : vector<1x32xf32>, vector<32x256xf32>, vector<1x256xf32> -> vector<1x256xf32>
    %c0_13 = arith.constant 0 : index
    %c0_14 = arith.constant 0 : index
    %15 = vector.load %arg7[%c0_13, %c0_14] : memref<1x1xf32, #tpu.memory_space<vmem>>, vector<1x1xf32>
    %16 = vector.broadcast %15 : vector<1x1xf32> to vector<1x256xf32>
    %17 = arith.addf %14, %16 : vector<1x256xf32>
    %c0_15 = arith.constant 0 : index
    %c0_16 = arith.constant 0 : index
    %18 = vector.load %arg8[%c0_15, %c0_16] : memref<1x256xf32, #tpu.memory_space<vmem>>, vector<1x256xf32>
    tpu.vector_store %arg8[%c0_15, %c0_16], %17 {strides = array<i32>} : memref<1x256xf32, #tpu.memory_space<vmem>>, vector<1x256xf32>,
    return
  }
  func.func @transform_0(%arg0: i32) -> (i32, i32) {
    %c0_i32 = arith.constant 0 : i32
    %c0_i32_0 = arith.constant 0 : i32
    return %c0_i32, %arg0 : i32, i32
  }
  func.func @transform_1(%arg0: i32) -> (i32, i32) {
    %c0_i32 = arith.constant 0 : i32
    %c0_i32_0 = arith.constant 0 : i32
    %c0_i32_1 = arith.constant 0 : i32
    return %c0_i32, %c0_i32_0 : i32, i32
  }
  func.func @transform_2(%arg0: i32) -> (i32, i32) {
    %c0_i32 = arith.constant 0 : i32
    %c0_i32_0 = arith.constant 0 : i32
    %c0_i32_1 = arith.constant 0 : i32
    return %c0_i32, %c0_i32_0 : i32, i32
  }
  func.func @transform_3(%arg0: i32) -> (i32, i32) {
    %c0_i32 = arith.constant 0 : i32
    %c0_i32_0 = arith.constant 0 : i32
    %c0_i32_1 = arith.constant 0 : i32
    return %c0_i32, %c0_i32_0 : i32, i32
  }
  func.func @transform_4(%arg0: i32) -> (i32, i32) {
    %c0_i32 = arith.constant 0 : i32
    %c0_i32_0 = arith.constant 0 : i32
    %c0_i32_1 = arith.constant 0 : i32
    return %c0_i32, %c0_i32_0 : i32, i32
  }
  func.func @transform_5(%arg0: i32) -> (i32, i32) {
    %c0_i32 = arith.constant 0 : i32
    %c0_i32_0 = arith.constant 0 : i32
    %c0_i32_1 = arith.constant 0 : i32
    return %c0_i32, %c0_i32_0 : i32, i32
  }
  func.func @transform_6(%arg0: i32) -> (i32, i32) {
    %c0_i32 = arith.constant 0 : i32
    %c0_i32_0 = arith.constant 0 : i32
    %c0_i32_1 = arith.constant 0 : i32
    return %c0_i32, %c0_i32_0 : i32, i32
  }
  func.func @transform_7(%arg0: i32) -> (i32, i32) {
    %c0_i32 = arith.constant 0 : i32
    %c0_i32_0 = arith.constant 0 : i32
    return %c0_i32, %arg0 : i32, i32
  }
}

</mosaic_0001>

<bundles_post_ra>
// kernel: _lambda_.1
= control target key start
LH: loop header
LB: loop body
LE: loop exit
PB: predicated region body
PF: predicated region fallthrough
CT: control target
= control target key end

     0   :  { %s1167_s0 = inlined_call_operand.vmem [shape: f32[4,512], index: 0, kind: input, shape index: {}]   ;;  %s1168_s1 = inlined_call_operand.hbm [shape: f32[32,4], index: 1, kind: input, shape index: {}]   ;;  %s1169_s2 = inlined_call_operand.hbm [shape: f32[32,1], index: 2, kind: input, shape index: {}]   ;;  %s1170_s3 = inlined_call_operand.hbm [shape: f32[32,32], index: 3, kind: input, shape index: {}]   ;;  %s1171_s4 = inlined_call_operand.vmem [shape: f32[32,1], index: 4, kind: input, shape index: {}]   ;;  %s1172_s5 = inlined_call_operand.vmem [shape: f32[1,32], index: 5, kind: input, shape index: {}]   ;;  %s1173_s6 = inlined_call_operand.<no memory space> [shape: f32[1,1], index: 6, kind: input, shape index: {}]   ;;  %s1174_s7 = inlined_call_operand.vmem [shape: f32[1,512], index: 7, kind: output, shape index: {}]  }
   0x1   :  { %v12_v0 = vstv %s1173_s6 }
   0x2   :  { %13 = vst [vmem:[#allocation2] sm:$0x1] %v12_v0 }
   0x3   :  { %14 = vsyncpa [#allocation4], 0 }
   0x4   :  { %15 = vsyncpa [#allocation6], 0  ;;  %s1050_s26 = smov 0  }
   0x5 LB: > { %s799_s27 = sadd.s32 4294967295, %s997_s26   ;;  %p801_p0 = scmp.ge.s32.totalorder %s997_s26, 1  ;;  %s997_s26 = sphi %s1050_s26, %s21_s26  }
   0x6   : > { %p204_p1 = scmp.lt.s32.totalorder %s997_s26, 3  ;;  %p1060_p2 = scmp.eq.s32.totalorder %s799_s27, 0 }
   0x7   : > { %s999_s29 = smov [#allocation5]   ;;  %s1000_s8 = smov [#allocation3]  }
   0x8   : > { %p1064_p3 = pnand %p801_p0, %p204_p1  ;;  %s229_s30 = sshll.u32 %s999_s29, 4  ;;  %s230_s30 = int_to_ptr.vmem [resolvable:$true] %s229_s30 }
   0x9   : > { %s216_s9 = sshll.u32 %s1000_s8, 4  ;;  %s1001_s11 = smov [#allocation7]   ;;  %s217_s9 = int_to_ptr.vmem [resolvable:$true] %s216_s9 }
   0xa   : > { %p838_p4 = pneg %p1064_p3  ;;  %s242_s12 = sshll.u32 %s1001_s11, 4  ;;  %s1076_s12 = int_to_ptr.vmem [resolvable:$true] %s242_s12 }
   0xb   : > { %s916_s13 = scalar_lea.vmem %s230_s30, 512  ;;  %p924_p10 = scmp.lt.s32.totalorder %s230_s30, %s230_s30 }
   0xc   : > { %p1072_p5 = pnand %p1060_p2, %p838_p4  ;;  %p917_p7 = scmp.ne.s32.totalorder %s230_s30, %s916_s13 }
   0xd   : > { %p925_p11 = scmp.lt.s32.totalorder %s916_s13, %s916_s13 }
   0xe   : > { %p907_p6 = pneg %p1072_p5 }
   0xf   : > { %p926_p12 = por %p925_p11, %p924_p10 }
  0x10   : > { %p919_p8 = pnand %p917_p7, %p907_p6 }
  0x12   : > { %p920_p9 = pneg %p919_p8 }
  0x14   : > { %p927_p13 = pnand %p926_p12, %p920_p9 }
  0x16   : > { %930 = shalt.err (!%p927_p13)
}
  0x17   : > { %s1002_s14 = smov 128   ;;  %s1003_s15 = smov 8  }
  0x18   : > { %844 = dma.hbm_to_vmem [thread:$0]  (!%p1072_p5), %s1169_s2, 512, %s230_s30, [#allocation6], %s1002_s14, %s1002_s14, %s1003_s15  }
  0x19   : > { %s942_s18 = scalar_lea.vmem %s217_s9, 512  ;;  %p950_p7 = scmp.lt.s32.totalorder %s217_s9, %s217_s9 }
  0x1a   : > { %p943_p0 = scmp.ne.s32.totalorder %s217_s9, %s942_s18  ;;  %p951_p8 = scmp.lt.s32.totalorder %s942_s18, %s942_s18 }
  0x1c   : > { %p945_p1 = pnand %p943_p0, %p907_p6  ;;  %p952_p10 = por %p951_p8, %p950_p7 }
  0x1e   : > { %p946_p4 = pneg %p945_p1 }
  0x20   : > { %p953_p9 = pnand %p952_p10, %p946_p4 }
  0x22   : > { %956 = shalt.err (!%p953_p9)
}
  0x23   : > { %841 = dma.hbm_to_vmem [thread:$0]  (!%p1072_p5), %s1168_s1, 512, %s217_s9, [#allocation4], %s1002_s14, %s1002_s14, %s1003_s15  }
  0x24   : > { %s968_s21 = scalar_lea.vmem %s1076_s12, 512  ;;  %p976_p0 = scmp.lt.s32.totalorder %s1076_s12, %s1076_s12 }
  0x25   : > { %p969_p11 = scmp.ne.s32.totalorder %s1076_s12, %s968_s21  ;;  %p977_p1 = scmp.lt.s32.totalorder %s968_s21, %s968_s21 }
  0x27   : > { %p971_p12 = pnand %p969_p11, %p907_p6  ;;  %p978_p4 = por %p977_p1, %p976_p0 }
  0x29   : > { %p972_p13 = pneg %p971_p12 }
  0x2b   : > { %p979_p7 = pnand %p978_p4, %p972_p13 }
  0x2d   : > { %982 = shalt.err (!%p979_p7)
}
  0x2e   : > { %847 = dma.hbm_to_vmem [thread:$0]  (!%p1072_p5), %s1170_s3, 512, %s1076_s12, [#allocation6], %s1002_s14, %s1002_s14, %s1003_s15  }
  0x2f   : > { %276 = sbr.rel (%p1064_p3) target bundleno = 732 (0x2dc), region = 48 }
  0x34   : > { %988 = dma.done.wait (%p1060_p2), [#allocation4], 512  }
  0x35   : > { %990 = vsyncadd (%p1060_p2), [#allocation4], 4294966784 }
  0x36   : > { %992 = dma.done.wait (%p1060_p2), [#allocation6], 1024  }
  0x37   : > { %994 = vsyncadd (%p1060_p2), [#allocation6], 4294966272  ;;  %s810_s24 = sshll.u32 %s799_s27, 1  ;;  %v1004_v1 = vmov 0.0   ;;  %v1005_v2 = vmov 0   ;;  %vm370_vm0 = vcmask 1043456  }
  0x38   : > { %p316_p6 = scmp.lt.s32.totalorder %s810_s24, 3  ;;  %439 = vmatprep.mubr.f32.mxu0 %v1004_v1  ;;  %577 = vmatprep.mubr.f32.mxu1 %v1004_v1  ;;  %v334_v5 = vld [vmem:[#allocation5 + $0x18] sm:$0xff]  ;;  %v327_v6 = vld [vmem:[#allocation3] sm:$0xff]  ;;  %vm357_vm1 = vcmask 31744   ;;  %v332_v7 = vld [vmem:[#allocation5 + $0x8] sm:$0xff]  ;;  %vm500_vm2 = vcmask 261120  }
  0x39   : > { %871 = vset.pattern.permute.xlu1 %v1005_v2  ;;  %870 = vset.pattern.permute.xlu0 %v1005_v2  ;;  %v333_v8 = vld [vmem:[#allocation5 + $0x10] sm:$0xff]  ;;  %v331_v9 = vld [vmem:[#allocation5] sm:$0xff]  ;;  %v328_v10 = vld [vmem:[#allocation3 + $0x8] sm:$0xff] }
  0x3a   : > { %s1179_s24 = smov (!%p316_p6, %s810_s24), 3  ;;  %352 = vperm.xlu0 %870, %v334_v5   ;;  %342 = vperm.xlu1 %871, %v332_v7   ;;  %v479_v11 = vld [vmem:[%s1171_s4 + $0x18] sm:$0xff]  ;;  %v478_v12 = vld [vmem:[%s1171_s4 + $0x10] sm:$0xff]  ;;  %v477_v14 = vld [vmem:[%s1171_s4 + $0x8] sm:$0xff] }
  0x3b   : > { %s811_s25 = sshll.u32 %s1179_s24, 2  ;;  %v329_v13 = vld [vmem:[#allocation3 + $0x10] sm:$0xff]  ;;  %v476_v15 = vld [vmem:[%s1171_s4] sm:$0xff]  ;;  %v473_v47 = vld [vmem:[#allocation7 + $0x8] sm:$0xff]  ;;  %s324_s18 = scalar_lea.vmem %s1174_s7, %s1179_s24 }
  0x3c   : > { %s319_s6 = scalar_lea.vmem %s1167_s0, %s811_s25  ;;  %v330_v16 = vld [vmem:[#allocation3 + $0x18] sm:$0xff]  ;;  %v472_v45 = vld [vmem:[#allocation7] sm:$0xff]  ;;  %v474_v48 = vld [vmem:[#allocation7 + $0x10] sm:$0xff] }
  0x3d   : > { %v326_v3 = vld [vmem:[%s319_s6] sm:$0xff] }
  0x3e   : > { %v356_v4 = vcombine.high %v326_v3, %v326_v3  ;;  %347 = vperm.xlu0 %870, %v333_v8   ;;  %337 = vperm.xlu1 %871, %v331_v9   ;;  %v611_v17 = vld [vmem:[#allocation2] sm:$0x1] }
  0x3f   : > { %v475_v49 = vld [vmem:[#allocation7 + $0x18] sm:$0xff] }
  0x40   : > { %813 = vmatprep.subr.msk.mxu0 %vm370_vm0, %v356_v4 }
  0x41   : > { %814 = vmatpush1.msk.msra.mxu0 %vm370_vm0, %v326_v3 }
  0x42   : > { %815 = vmatmul.mubr.msk.f32.vlgmr.msra.gmra.mxu0 %vm357_vm1, %v327_v6  ;;  %497 = vperm.xlu0 %870, %v479_v11  }
  0x43   : > { %445 = vmatprep.mubr.f32.mxu0 %v1004_v1  ;;  %492 = vperm.xlu1 %871, %v478_v12  }
  0x46   : > { %816 = vmatmul.mubr.msk.f32.gmra.mxu0 %vm357_vm1, %v328_v10  ;;  %487 = vperm.xlu0 %870, %v477_v14  }
  0x47   : > { %451 = vmatprep.mubr.f32.mxu0 %v1004_v1  ;;  %482 = vperm.xlu1 %871, %v476_v15   ;;  %v617_v15 = vlaneseq }
  0x49   : > { %vm715_vm3 = vcmp.lt.s32.totalorder %v617_v15, 256 }
  0x4a   : > { %817 = vmatmul.mubr.msk.f32.gmra.mxu0 %vm357_vm1, %v329_v13  ;;  %614 = vperm.xlu0 %870, %v611_v17   ;;  %v610_v13 = vld [vmem:[%s1172_s5] sm:$0x1]  ;;  %v1006_v17 = vmov 1966171168  }
  0x4b   : > { %457 = vmatprep.mubr.f32.mxu0 %v1004_v1 }
  0x4e   : > { %818 = vmatmul.mubr.msk.f32.gmra.mxu0 %vm357_vm1, %v330_v16  ;;  %v618_v16 = vshrl.u32 %v617_v15, 7 }
  0x4f   : > { %688 = vmatprep.mubr.f32.mxu0 %v1004_v1 }
  0xb5   : > { %v353_v22 = vpop.permute.xlu0 %352  ;;  %v343_v25 = vpop.permute.xlu1 %342 }
  0xb9   : > { %v348_v27 = vpop.permute.xlu0 %347  ;;  %v338_v33 = vpop.permute.xlu1 %337 }
  0xbd   : > { %v498_v55 = vpop.permute.xlu0 %497 }
  0xbe   : > { %v493_v57 = vpop.permute.xlu1 %492 }
  0xc1   : > { %v488_v63 = vpop.permute.xlu0 %487 }
 0x102   : > { %v441_v18 = vpop.f32.mrf.mxu0 }
 0x103   : > { %v442_v37 = vadd.f32 %v441_v18, %v338_v33  ;;  %v699_v18 = vunpack.c.l.s4 %v1006_v17 }
 0x104   : > { %v443_v19 = vpop.f32.mrf.mxu0 }
 0x105   : > { %v444_v36 = vadd.f32 %v443_v19, %v338_v33  ;;  %v619_v19 = vsub.s32 0, %v618_v16 }
 0x106   : > { %v447_v20 = vpop.f32.mrf.mxu0 }
 0x107   : > { %v448_v35 = vadd.f32 %v447_v20, %v343_v25  ;;  %v615_v20 = vpop.permute.xlu0 %614 }
 0x108   : > { %v449_v21 = vpop.f32.mrf.mxu0 }
 0x109   : > { %v450_v34 = vadd.f32 %v449_v21, %v343_v25  ;;  %v700_v21 = vunpack.c.0.s8 %v699_v18 }
 0x10a   : > { %v453_v23 = vpop.f32.mrf.mxu0 }
 0x10b   : > { %v454_v32 = vadd.f32 %v453_v23, %v348_v27  ;;  %v620_v23 = vrot.slane %v615_v20, %v619_v19 }
 0x10c   : > { %v455_v24 = vpop.f32.mrf.mxu0 }
 0x10d   : > { %v456_v30 = vadd.f32 %v455_v24, %v348_v27  ;;  %v703_v27 = vsub.s32 %v700_v21, %v618_v16 }
 0x10e   : > { %v459_v26 = vpop.f32.mrf.mxu0 }
 0x10f   : > { %v460_v28 = vadd.f32 %v459_v26, %v353_v22 }
 0x110   : > { %v461_v29 = vpop.f32.mrf.mxu0 }
 0x111   : > { %v462_v31 = vadd.f32 %v461_v29, %v353_v22 }
 0x113   : > { %873 = vtanh.f32 %v462_v31 }
 0x114   : > { %875 = vtanh.f32 %v460_v28 }
 0x115   : > { %877 = vtanh.f32 %v456_v30 }
 0x116   : > { %879 = vtanh.f32 %v454_v32 }
 0x117   : > { %881 = vtanh.f32 %v450_v34 }
 0x118   : > { %883 = vtanh.f32 %v448_v35 }
 0x119   : > { %885 = vtanh.f32 %v444_v36 }
 0x11a   : > { %887 = vtanh.f32 %v442_v37 }
 0x120   : > { %v874_v38 = vpop.eup %873 }
 0x121   : > { %v876_v39 = vpop.eup %875  ;;  %537 = vmatprep.subr.mxu1 %v874_v38 }
 0x122   : > { %v878_v40 = vpop.eup %877  ;;  %538 = vmatpush1.msra.mxu1 %v876_v39 }
 0x123   : > { %v880_v41 = vpop.eup %879  ;;  %539 = vmatprep.subr.mxu1 %v878_v40 }
 0x124   : > { %v882_v42 = vpop.eup %881  ;;  %540 = vmatpush1.msra.mxu1 %v880_v41 }
 0x125   : > { %v884_v43 = vpop.eup %883  ;;  %541 = vmatprep.subr.mxu1 %v882_v42 }
 0x126   : > { %v886_v44 = vpop.eup %885  ;;  %542 = vmatpush1.msra.mxu1 %v884_v43 }
 0x127   : > { %v888_v46 = vpop.eup %887  ;;  %543 = vmatprep.subr.mxu1 %v886_v44 }
 0x128   : > { %544 = vmatpush1.msra.mxu1 %v888_v46 }
 0x129   : > { %819 = vmatmul.mubr.msk.f32.vlgmr.msra.gmra.mxu1 %vm500_vm2, %v472_v45 }
 0x12a   : > { %583 = vmatprep.mubr.f32.mxu1 %v1004_v1 }
 0x12d   : > { %820 = vmatmul.mubr.msk.f32.gmra.mxu1 %vm500_vm2, %v473_v47 }
 0x12e   : > { %589 = vmatprep.mubr.f32.mxu1 %v1004_v1 }
 0x131   : > { %821 = vmatmul.mubr.msk.f32.gmra.mxu1 %vm500_vm2, %v474_v48 }
 0x132   : > { %595 = vmatprep.mubr.f32.mxu1 %v1004_v1  ;;  %v483_v1 = vpop.permute.xlu1 %482 }
 0x135   : > { %822 = vmatmul.mubr.msk.f32.gmra.mxu1 %vm500_vm2, %v475_v49 }
 0x1e9   : > { %v579_v50 = vpop.f32.mrf.mxu1 }
 0x1ea   : > { %v580_v5 = vadd.f32 %v579_v50, %v483_v1 }
 0x1eb   : > { %v581_v51 = vpop.f32.mrf.mxu1 }
 0x1ec   : > { %v582_v4 = vadd.f32 %v581_v51, %v483_v1 }
 0x1ed   : > { %v585_v52 = vpop.f32.mrf.mxu1 }
 0x1ee   : > { %v586_v3 = vadd.f32 %v585_v52, %v488_v63 }
 0x1ef   : > { %v587_v53 = vpop.f32.mrf.mxu1 }
 0x1f0   : > { %v588_v2 = vadd.f32 %v587_v53, %v488_v63 }
 0x1f1   : > { %v591_v54 = vpop.f32.mrf.mxu1 }
 0x1f2   : > { %v592_v0 = vadd.f32 %v591_v54, %v493_v57 }
 0x1f3   : > { %v593_v56 = vpop.f32.mrf.mxu1 }
 0x1f4   : > { %v594_v61 = vadd.f32 %v593_v56, %v493_v57 }
 0x1f5   : > { %v597_v58 = vpop.f32.mrf.mxu1 }
 0x1f6   : > { %v598_v59 = vadd.f32 %v597_v58, %v498_v55 }
 0x1f7   : > { %v599_v60 = vpop.f32.mrf.mxu1 }
 0x1f8   : > { %v600_v62 = vadd.f32 %v599_v60, %v498_v55 }
 0x1fa   : > { %889 = vtanh.f32 %v600_v62 }
 0x1fb   : > { %891 = vtanh.f32 %v598_v59 }
 0x1fc   : > { %893 = vtanh.f32 %v594_v61 }
 0x1fd   : > { %895 = vtanh.f32 %v592_v0 }
 0x1fe   : > { %897 = vtanh.f32 %v588_v2 }
 0x1ff   : > { %899 = vtanh.f32 %v586_v3 }
 0x200   : > { %901 = vtanh.f32 %v582_v4 }
 0x201   : > { %903 = vtanh.f32 %v580_v5 }
 0x207   : > { %v890_v6 = vpop.eup %889 }
 0x208   : > { %v892_v7 = vpop.eup %891  ;;  %648 = vmatprep.subr.mxu0 %v890_v6 }
 0x209   : > { %v894_v8 = vpop.eup %893  ;;  %649 = vmatpush1.msra.mxu0 %v892_v7 }
 0x20a   : > { %v896_v9 = vpop.eup %895  ;;  %650 = vmatprep.subr.mxu0 %v894_v8 }
 0x20b   : > { %v898_v10 = vpop.eup %897  ;;  %651 = vmatpush1.msra.mxu0 %v896_v9 }
 0x20c   : > { %v900_v11 = vpop.eup %899  ;;  %652 = vmatprep.subr.mxu0 %v898_v10 }
 0x20d   : > { %v902_v12 = vpop.eup %901  ;;  %653 = vmatpush1.msra.mxu0 %v900_v11 }
 0x20e   : > { %v904_v14 = vpop.eup %903  ;;  %654 = vmatprep.subr.mxu0 %v902_v12 }
 0x20f   : > { %655 = vmatpush1.msra.mxu0 %v904_v14 }
 0x210   : > { %823 = vmatmul.mubr.msk.f32.vlgmr.msra.gmra.mxu0 %vm500_vm2, %v610_v13 }
 0x2d0   : > { %v690_v22 = vpop.f32.mrf.mxu0 }
 0x2d1   : > { %v691_v25 = vadd.f32 %v690_v22, %v620_v23 }
 0x2d2   : > { %v692_v24 = vpop.f32.mrf.mxu0 }
 0x2d3   : > { %v693_v26 = vadd.f32 %v692_v24, %v620_v23 }
 0x2d5   : > { %v697_v28 = vcombine.low %v691_v25, %v693_v26 }
 0x2d7   : > { %v704_v29 = vrot.slane %v697_v28, %v703_v27 }
 0x2d9   : > { %v711_v30 = vrot.slane %v704_v29, %v703_v27 }
 0x2db   : > { %717 = vst.msk [vmem:[%s324_s18] sm:$0x3] %vm715_vm3, %v711_v30 }
 0x2dc PF: > { %s21_s26 = sadd.s32 1, %s997_s26  }
 0x2dd   : > { %p18_p2 = scmp.ge.s32.totalorder %s21_s26, 4  }
 0x2df   :  { %20 = sbr.rel (!%p18_p2) target bundleno = 5 (0x5), region = 91 }
 0x2e4   :  { %738 = vsyncpa [#allocation4], 1 }
 0x2e5   :  { %740 = vsyncpa [#allocation4 + $0x1], 1 }
 0x2e6   :  { %741 = vsyncpa [#allocation6], 1 }

</bundles_post_ra>
